<compile_context>
chip_gen: v7x
topology: tpu7x:2x2x1
jax: 0.10.0
libtpu: 0.0.40
codegen_flags: <defaults>
</compile_context>

<pallas_src>
import functools

import jax
import jax.numpy as jnp
from jax.experimental import pallas as pl
from jax.experimental.pallas import tpu as pltpu

_EPS = 1e-12  # F.normalize default eps


def _ft_loss_kernel(beta, batch, dim, t_ref, s_ref, logits_ref, labels_ref, out_ref):
    # ---- Factor-transfer partial: L1 between L2-normalized rows (fused) ----
    t = t_ref[...].astype(jnp.float32)          # (TB, D) teacher factor (detached)
    s = s_ref[...].astype(jnp.float32)          # (TB, D) student factor

    # 1/max(||x||, eps) == rsqrt(max(sum(x^2), eps^2)) ; rsqrt runs on the EUP.
    inv_t = jax.lax.rsqrt(jnp.maximum(jnp.sum(t * t, axis=1, keepdims=True), _EPS * _EPS))
    inv_s = jax.lax.rsqrt(jnp.maximum(jnp.sum(s * s, axis=1, keepdims=True), _EPS * _EPS))
    l1_sum = jnp.sum(jnp.abs(s * inv_s - t * inv_t))   # padded rows are all-zero -> 0

    # ---- Cross-entropy partial (sum over valid rows of this tile) ----
    logits = logits_ref[...].astype(jnp.float32)        # (TB, C)
    labels = labels_ref[...]                            # (TB, 1) int32, -1 == padded row
    tb, c = logits.shape
    m = jnp.max(logits, axis=1, keepdims=True)
    shifted = logits - m
    lse = jnp.log(jnp.sum(jnp.exp(shifted), axis=1, keepdims=True))          # (TB, 1)
    col = jax.lax.broadcasted_iota(jnp.int32, (tb, c), 1)
    picked = jnp.sum(jnp.where(col == labels, shifted, 0.0), axis=1, keepdims=True)
    valid = (labels >= 0).astype(jnp.float32)
    ce_sum = jnp.sum((lse - picked) * valid)

    # Pre-scale so the wrapper just sums the per-tile partials.
    partial = ce_sum / batch + beta * l1_sum / (batch * dim)
    out_ref[...] = jnp.broadcast_to(partial, out_ref.shape).astype(jnp.float32)


def _choose_tile_b(b, d, itemsize, vmem_budget_bytes=24 * 1024 * 1024):
    """Pick a batch tile: 2 double-buffered factor inputs + f32 temps under budget."""
    # 2 inputs x 2 pipeline buffers in original dtype + headroom for f32 elementwise temps.
    bytes_per_row = d * (itemsize * 2 * 2 + 4 * 6)
    tb = max(1, vmem_budget_bytes // max(bytes_per_row, 1))
    if tb >= b:
        return b                       # single tile covering the whole batch
    tb = (tb // 8) * 8                 # keep sublane alignment for partial tiles
    if tb < 8:
        return 8 if b >= 8 else b
    # Prefer a tile that divides the batch (skips the jnp.pad HBM copy of the factors),
    # but never shrink below half of the budget-derived tile just to avoid padding.
    for cand in range(tb, max(8, tb // 2) - 1, -8):
        if b % cand == 0:
            return cand
    return tb


def factor_transfer_loss(factor_teacher, factor_student, logits, labels, *, beta,
                         tile_b=None):
    """factor_teacher/student: NCHW arrays; logits: (B, C); labels: (B,) int."""
    b = factor_teacher.shape[0]
    t2 = factor_teacher.reshape(b, -1)          # row-major == torch .view(B, -1)
    s2 = factor_student.reshape(b, -1)
    d = t2.shape[1]
    c = logits.shape[1]
    labels2 = labels.astype(jnp.int32).reshape(b, 1)

    itemsize = max(jnp.dtype(t2.dtype).itemsize, jnp.dtype(s2.dtype).itemsize)
    tb = min(tile_b, b) if tile_b is not None else _choose_tile_b(b, d, itemsize)
    nt = -(-b // tb)                             # cdiv
    b_pad = nt * tb
    if b_pad != b:
        pad = b_pad - b
        t2 = jnp.pad(t2, ((0, pad), (0, 0)))                      # zero rows -> 0 L1
        s2 = jnp.pad(s2, ((0, pad), (0, 0)))
        logits = jnp.pad(logits, ((0, pad), (0, 0)))
        labels2 = jnp.pad(labels2, ((0, pad), (0, 0)), constant_values=-1)

    kernel = functools.partial(_ft_loss_kernel, float(beta), float(b), float(d))

    cost = pl.CostEstimate(
        flops=int(8 * b_pad * d + 6 * b_pad * c),
        transcendentals=int(b_pad * (c + 3)),
        bytes_accessed=int(
            b_pad * d * (jnp.dtype(t2.dtype).itemsize + jnp.dtype(s2.dtype).itemsize)
            + b_pad * c * jnp.dtype(logits.dtype).itemsize
            + b_pad * 4
            + nt * 8 * 128 * 4
        ),
    )

    partials = pl.pallas_call(
        kernel,
        grid=(nt,),
        in_specs=[
            pl.BlockSpec((tb, d), lambda i: (i, 0)),      # teacher factor (orig dtype)
            pl.BlockSpec((tb, d), lambda i: (i, 0)),      # student factor (orig dtype)
            pl.BlockSpec((tb, c), lambda i: (i, 0)),      # logits
            pl.BlockSpec((tb, 1), lambda i: (i, 0)),      # labels (int32)
        ],
        out_specs=pl.BlockSpec((1, 8, 128), lambda i: (i, 0, 0)),
        out_shape=jax.ShapeDtypeStruct((nt, 8, 128), jnp.float32),
        compiler_params=pltpu.CompilerParams(
            dimension_semantics=("parallel",),
            vmem_limit_bytes=32 * 1024 * 1024,
        ),
        cost_estimate=cost,
    )(t2, s2, logits, labels2)

    # Tiny final combine of lane-dense per-tile partial sums.
    return jnp.sum(partials[:, 0, 0])


def _reference_loss(factor_teacher, factor_student, logits, labels, beta):
    b = factor_teacher.shape[0]
    t = factor_teacher.reshape(b, -1).astype(jnp.float32)
    s = factor_student.reshape(b, -1).astype(jnp.float32)
    t_hat = t / jnp.maximum(jnp.linalg.norm(t, axis=1, keepdims=True), _EPS)
    s_hat = s / jnp.maximum(jnp.linalg.norm(s, axis=1, keepdims=True), _EPS)
    l1 = jnp.mean(jnp.abs(s_hat - t_hat))
    logp = jax.nn.log_softmax(logits.astype(jnp.float32), axis=1)
    ce = -jnp.mean(jnp.take_along_axis(logp, labels[:, None], axis=1))
    return ce + beta * l1


if __name__ == "__main__":
    key = jax.random.PRNGKey(0)
    k1, k2, k3, k4 = jax.random.split(key, 4)

    # --- primary small-shape check (matches the module's typical conv-factor use) ---
    B, C, H, W = 2, 4, 16, 16        # factor shape (NCHW)
    num_classes = 10
    beta = 0.5                       # deterministic hyperparameter from __init__

    factor_teacher = jax.random.normal(k1, (B, C, H, W), dtype=jnp.float32)
    factor_student = jax.random.normal(k2, (B, C, H, W), dtype=jnp.float32)
    logits = jax.random.normal(k3, (B, num_classes), dtype=jnp.float32)
    labels = jax.random.randint(k4, (B,), 0, num_classes, dtype=jnp.int32)

    loss = factor_transfer_loss(factor_teacher, factor_student, logits, labels, beta=beta)
    jax.block_until_ready(loss)
    ref = _reference_loss(factor_teacher, factor_student, logits, labels, beta)
    assert jnp.allclose(loss, ref, atol=1e-5, rtol=1e-5), (loss, ref)

    # --- secondary check: bf16 factors on the wire + multi-tile grid + batch padding ---
    B2 = 12
    ft2 = jax.random.normal(k1, (B2, C, H, W), dtype=jnp.bfloat16)
    fs2 = jax.random.normal(k2, (B2, C, H, W), dtype=jnp.bfloat16)
    lg2 = jax.random.normal(k3, (B2, num_classes), dtype=jnp.float32)
    lb2 = jax.random.randint(k4, (B2,), 0, num_classes, dtype=jnp.int32)

    loss2 = factor_transfer_loss(ft2, fs2, lg2, lb2, beta=beta, tile_b=8)
    jax.block_until_ready(loss2)
    ref2 = _reference_loss(ft2, fs2, lg2, lb2, beta)
    assert jnp.allclose(loss2, ref2, atol=1e-4, rtol=1e-4), (loss2, ref2)

    # --- tertiary check: auto tile chooser picks a batch-dividing tile (no pad copy) ---
    B3 = 16
    ft3 = jax.random.normal(k1, (B3, C, H, W), dtype=jnp.float32)
    fs3 = jax.random.normal(k2, (B3, C, H, W), dtype=jnp.float32)
    lg3 = jax.random.normal(k3, (B3, num_classes), dtype=jnp.float32)
    lb3 = jax.random.randint(k4, (B3,), 0, num_classes, dtype=jnp.int32)

    loss3 = factor_transfer_loss(ft3, fs3, lg3, lb3, beta=beta)
    jax.block_until_ready(loss3)
    ref3 = _reference_loss(ft3, fs3, lg3, lb3, beta)
    assert jnp.allclose(loss3, ref3, atol=1e-5, rtol=1e-5), (loss3, ref3)

    print("KERNEL_OK")
</pallas_src>

<mosaic_0001>
module attributes {stable_mosaic.version = 11 : i64} {
  func.func @_ft_loss_kernel(%arg0: i32, %arg1: memref<2x1024xf32, #tpu.memory_space<vmem>>, %arg2: memref<2x1024xf32, #tpu.memory_space<vmem>>, %arg3: memref<2x10xf32, #tpu.memory_space<vmem>>, %arg4: memref<2x1xi32, #tpu.memory_space<vmem>>, %arg5: memref<1x8x128xf32, #tpu.memory_space<vmem>>) attributes {dimension_semantics = [#tpu.dimension_semantics<parallel>], iteration_bounds = array<i64: 1>, scalar_prefetch = 0 : i64, scratch_operands = 0 : i64, tpu.core_type = #tpu.core_type<tc>, window_params = [{transform_indices = @transform_0, window_bounds = array<i64: 2, 1024>}, {transform_indices = @transform_1, window_bounds = array<i64: 2, 1024>}, {transform_indices = @transform_2, window_bounds = array<i64: 2, 10>}, {transform_indices = @transform_3, window_bounds = array<i64: 2, 1>}, {transform_indices = @transform_4, window_bounds = array<i64: 1, 8, 128>}]} {
    %c0 = arith.constant 0 : index
    %c0_0 = arith.constant 0 : index
    %0 = vector.load %arg1[%c0, %c0_0] : memref<2x1024xf32, #tpu.memory_space<vmem>>, vector<2x1024xf32>
    %c0_1 = arith.constant 0 : index
    %c0_2 = arith.constant 0 : index
    %1 = vector.load %arg2[%c0_1, %c0_2] : memref<2x1024xf32, #tpu.memory_space<vmem>>, vector<2x1024xf32>
    %2 = arith.mulf %0, %0 : vector<2x1024xf32>
    %cst = arith.constant dense<0.000000e+00> : vector<2xf32>
    %3 = vector.multi_reduction <add>, %2, %cst [1] : vector<2x1024xf32> to vector<2xf32>
    %4 = vector.shape_cast %3 : vector<2xf32> to vector<2x1xf32>
    %cst_3 = arith.constant 1.000000e-24 : f32
    %5 = vector.broadcast %cst_3 : f32 to vector<2x1xf32>
    %6 = arith.maximumf %4, %5 : vector<2x1xf32>
    %7 = math.rsqrt %6 : vector<2x1xf32>
    %8 = arith.mulf %1, %1 : vector<2x1024xf32>
    %cst_4 = arith.constant dense<0.000000e+00> : vector<2xf32>
    %9 = vector.multi_reduction <add>, %8, %cst_4 [1] : vector<2x1024xf32> to vector<2xf32>
    %10 = vector.shape_cast %9 : vector<2xf32> to vector<2x1xf32>
    %cst_5 = arith.constant 1.000000e-24 : f32
    %11 = vector.broadcast %cst_5 : f32 to vector<2x1xf32>
    %12 = arith.maximumf %10, %11 : vector<2x1xf32>
    %13 = math.rsqrt %12 : vector<2x1xf32>
    %14 = vector.broadcast %13 : vector<2x1xf32> to vector<2x1024xf32>
    %15 = arith.mulf %1, %14 : vector<2x1024xf32>
    %16 = vector.broadcast %7 : vector<2x1xf32> to vector<2x1024xf32>
    %17 = arith.mulf %0, %16 : vector<2x1024xf32>
    %18 = arith.subf %15, %17 : vector<2x1024xf32>
    %19 = math.absf %18 : vector<2x1024xf32>
    %20 = vector.shape_cast %19 : vector<2x1024xf32> to vector<1x2x1024xf32>
    %cst_6 = arith.constant dense<0.000000e+00> : vector<1xf32>
    %21 = vector.multi_reduction <add>, %20, %cst_6 [1, 2] : vector<1x2x1024xf32> to vector<1xf32>
    %22 = vector.shape_cast %21 : vector<1xf32> to vector<1x1x1xf32>
    %23 = vector.extract %22[0, 0, 0] : f32 from vector<1x1x1xf32>
    %c0_7 = arith.constant 0 : index
    %c0_8 = arith.constant 0 : index
    %24 = vector.load %arg3[%c0_7, %c0_8] : memref<2x10xf32, #tpu.memory_space<vmem>>, vector<2x10xf32>
    %c0_9 = arith.constant 0 : index
    %c0_10 = arith.constant 0 : index
    %25 = vector.load %arg4[%c0_9, %c0_10] : memref<2x1xi32, #tpu.memory_space<vmem>>, vector<2x1xi32>
    %cst_11 = arith.constant dense<0xFF800000> : vector<2xf32>
    %26 = vector.multi_reduction <maximumf>, %24, %cst_11 [1] : vector<2x10xf32> to vector<2xf32>
    %27 = vector.shape_cast %26 : vector<2xf32> to vector<2x1xf32>
    %28 = vector.broadcast %27 : vector<2x1xf32> to vector<2x10xf32>
    %29 = arith.subf %24, %28 : vector<2x10xf32>
    %30 = math.exp %29 : vector<2x10xf32>
    %cst_12 = arith.constant dense<0.000000e+00> : vector<2xf32>
    %31 = vector.multi_reduction <add>, %30, %cst_12 [1] : vector<2x10xf32> to vector<2xf32>
    %32 = vector.shape_cast %31 : vector<2xf32> to vector<2x1xf32>
    %33 = math.log %32 : vector<2x1xf32>
    %34 = tpu.iota {dimensions = array<i32: 1>} : vector<2x10xi32>
    %35 = vector.broadcast %25 : vector<2x1xi32> to vector<2x10xi32>
    %36 = arith.cmpi eq, %34, %35 : vector<2x10xi32>
    %cst_13 = arith.constant 0.000000e+00 : f32
    %37 = vector.broadcast %cst_13 : f32 to vector<2x10xf32>
    %38 = arith.select %36, %29, %37 : vector<2x10xi1>, vector<2x10xf32>
    %cst_14 = arith.constant dense<0.000000e+00> : vector<2xf32>
    %39 = vector.multi_reduction <add>, %38, %cst_14 [1] : vector<2x10xf32> to vector<2xf32>
    %40 = vector.shape_cast %39 : vector<2xf32> to vector<2x1xf32>
    %c0_i32 = arith.constant 0 : i32
    %41 = vector.broadcast %c0_i32 : i32 to vector<2x1xi32>
    %42 = arith.cmpi sge, %25, %41 : vector<2x1xi32>
    %43 = arith.extui %42 : vector<2x1xi1> to vector<2x1xi32>
    %44 = arith.sitofp %43 : vector<2x1xi32> to vector<2x1xf32>
    %45 = arith.subf %33, %40 : vector<2x1xf32>
    %46 = arith.mulf %45, %44 : vector<2x1xf32>
    %47 = vector.shape_cast %46 : vector<2x1xf32> to vector<1x2x1xf32>
    %cst_15 = arith.constant dense<0.000000e+00> : vector<1xf32>
    %48 = vector.multi_reduction <add>, %47, %cst_15 [1, 2] : vector<1x2x1xf32> to vector<1xf32>
    %49 = vector.shape_cast %48 : vector<1xf32> to vector<1x1x1xf32>
    %50 = vector.extract %49[0, 0, 0] : f32 from vector<1x1x1xf32>
    %cst_16 = arith.constant 2.000000e+00 : f32
    %51 = arith.divf %50, %cst_16 : f32
    %cst_17 = arith.constant 5.000000e-01 : f32
    %52 = arith.mulf %cst_17, %23 : f32
    %cst_18 = arith.constant 2.048000e+03 : f32
    %53 = arith.divf %52, %cst_18 : f32
    %54 = arith.addf %51, %53 : f32
    %55 = vector.broadcast %54 : f32 to vector<1x8x128xf32>
    %c0_19 = arith.constant 0 : index
    %c0_20 = arith.constant 0 : index
    %c0_21 = arith.constant 0 : index
    %56 = vector.load %arg5[%c0_19, %c0_20, %c0_21] : memref<1x8x128xf32, #tpu.memory_space<vmem>>, vector<1x8x128xf32>
    tpu.vector_store %arg5[%c0_19, %c0_20, %c0_21], %55 {strides = array<i32>} : memref<1x8x128xf32, #tpu.memory_space<vmem>>, vector<1x8x128xf32>,
    return
  }
  func.func @transform_0(%arg0: i32) -> (i32, i32) {
    %c0_i32 = arith.constant 0 : i32
    %c0_i32_0 = arith.constant 0 : i32
    return %arg0, %c0_i32 : i32, i32
  }
  func.func @transform_1(%arg0: i32) -> (i32, i32) {
    %c0_i32 = arith.constant 0 : i32
    %c0_i32_0 = arith.constant 0 : i32
    return %arg0, %c0_i32 : i32, i32
  }
  func.func @transform_2(%arg0: i32) -> (i32, i32) {
    %c0_i32 = arith.constant 0 : i32
    %c0_i32_0 = arith.constant 0 : i32
    return %arg0, %c0_i32 : i32, i32
  }
  func.func @transform_3(%arg0: i32) -> (i32, i32) {
    %c0_i32 = arith.constant 0 : i32
    %c0_i32_0 = arith.constant 0 : i32
    return %arg0, %c0_i32 : i32, i32
  }
  func.func @transform_4(%arg0: i32) -> (i32, i32, i32) {
    %c0_i32 = arith.constant 0 : i32
    %c0_i32_0 = arith.constant 0 : i32
    %c0_i32_1 = arith.constant 0 : i32
    return %arg0, %c0_i32, %c0_i32_0 : i32, i32, i32
  }
}

</mosaic_0001>

<bundles_post_ra>
// kernel: tpu_custom_call.1
= control target key start
LH: loop header
LB: loop body
LE: loop exit
PB: predicated region body
PF: predicated region fallthrough
CT: control target
= control target key end

     0   :  { %9 = vsyncpa [#allocation3], 0  ;;  %s579_s0 = inlined_call_operand.hbm [shape: f32[2,1024], index: 0, kind: input, shape index: {}]   ;;  %s580_s1 = inlined_call_operand.hbm [shape: f32[2,1024], index: 1, kind: input, shape index: {}]   ;;  %s581_s2 = inlined_call_operand.vmem [shape: f32[2,10], index: 2, kind: input, shape index: {}]   ;;  %s582_s3 = inlined_call_operand.vmem [shape: s32[2,1], index: 3, kind: input, shape index: {}]   ;;  %s583_s4 = inlined_call_operand.hbm [shape: f32[1,8,128], index: 4, kind: output, shape index: {}]  }
   0x1   :  { %10 = vsyncpa [#allocation6], 0 }
   0x2   :  { %11 = vsyncpa [#allocation4], 0  ;;  %s430_s15 = smov [#allocation2]   ;;  %s431_s17 = smov [#allocation5]  }
   0x3   :  { %s18_s16 = sshll.u32 %s430_s15, 4  ;;  %s28_s18 = sshll.u32 %s431_s17, 4  ;;  %s19_s16 = int_to_ptr.vmem [resolvable:$true] %s18_s16  ;;  %s29_s18 = int_to_ptr.vmem [resolvable:$true] %s28_s18 }
   0x4   :  { %s358_s21 = scalar_lea.hbm %s579_s0, 256 }
   0x5   :  { %p359_p0 = scmp.ne.s32.totalorder %s579_s0, %s358_s21  ;;  %p362_p1 = scmp.lt.u32.totalorder %s358_s21, %s579_s0 }
   0x7   :  { %p364_p2 = pnand %p362_p1, %p359_p0 }
   0x9   :  { %367 = shalt.err (!%p364_p2)
}
   0xa   :  { %s368_s26 = scalar_lea.vmem %s19_s16, 256  ;;  %p373_p4 = scmp.lt.s32.totalorder %s19_s16, %s19_s16 }
   0xb   :  { %p369_p3 = scmp.ne.s32.totalorder %s19_s16, %s368_s26  ;;  %p374_p5 = scmp.lt.s32.totalorder %s368_s26, %s368_s26 }
   0xd   :  { %p375_p6 = por %p374_p5, %p373_p4 }
   0xf   :  { %p376_p7 = pnand %p375_p6, %p369_p3 }
  0x11   :  { %379 = shalt.err (!%p376_p7)
}
  0x12   :  { %21 = dma.hbm_to_vmem [thread:$0]  %s579_s0, 256, %s19_s16, [#allocation3]  }
  0x13   :  { %s380_s5 = scalar_lea.hbm %s580_s1, 256 }
  0x14   :  { %p381_p8 = scmp.ne.s32.totalorder %s580_s1, %s380_s5  ;;  %p384_p9 = scmp.lt.u32.totalorder %s380_s5, %s580_s1 }
  0x16   :  { %p386_p10 = pnand %p384_p9, %p381_p8 }
  0x18   :  { %389 = shalt.err (!%p386_p10)
}
  0x19   :  { %s390_s10 = scalar_lea.vmem %s29_s18, 256  ;;  %p395_p12 = scmp.lt.s32.totalorder %s29_s18, %s29_s18 }
  0x1a   :  { %p391_p11 = scmp.ne.s32.totalorder %s29_s18, %s390_s10  ;;  %p396_p13 = scmp.lt.s32.totalorder %s390_s10, %s390_s10 }
  0x1c   :  { %p397_p0 = por %p396_p13, %p395_p12 }
  0x1e   :  { %p398_p1 = pnand %p397_p0, %p391_p11 }
  0x20   :  { %401 = shalt.err (!%p398_p1)
}
  0x21   :  { %31 = dma.hbm_to_vmem [thread:$0]  %s580_s1, 256, %s29_s18, [#allocation6]  }
  0x22   :  { %424 = dma.done.wait [#allocation3], 256  }
  0x23   :  { %425 = vsyncadd [#allocation3], 4294967040 }
  0x24   :  { %426 = dma.done.wait [#allocation6], 256  }
  0x25   :  { %427 = vsyncadd [#allocation6], 4294967040  ;;  %v54_v0 = vlaneseq  ;;  %v432_v1 = vmov 0   ;;  %v433_v2 = vmov 1983009808   ;;  %vm273_vm0 = vcmask 74752  }
  0x26   :  { %349 = vset.pattern.permute.xlu0 %v432_v1  ;;  %v52_v3 = vunpack.c.l.s4 %v433_v2  ;;  %v495_v7 = vld [vmem:[%s581_s2] sm:$0x3]  ;;  %v501_v10 = vld [vmem:[#allocation2 + $0x8] sm:$0xff]  ;;  %v505_v12 = vld [vmem:[#allocation5] sm:$0xff]  ;;  %vm92_vm1 = vcmask 1041408   ;;  %vm300_vm4 = vcmask 1024  }
  0x27   :  { %v487_v4 = vshrl.u32 %v54_v0, 7  ;;  %v497_v8 = vld [vmem:[#allocation2] sm:$0xff]  ;;  %v274_v9 = vsel %vm273_vm0, %v495_v7, -inf  ;;  %v507_v13 = vld [vmem:[#allocation5 + $0x8] sm:$0xff]  ;;  %v47_v14 = vmul.f32 %v501_v10, %v501_v10  ;;  %v112_v15 = vmul.f32 %v505_v12, %v505_v12  ;;  %s436_s18 = smov [#allocation7]  }
  0x28   :  { %v53_v5 = vunpack.c.0.s8 %v52_v3  ;;  %v46_v11 = vmul.f32 %v497_v8, %v497_v8  ;;  %275 = vmax.xlane.f32.xlu0 %v274_v9  ;;  %v113_v19 = vmul.f32 %v507_v13, %v507_v13  ;;  %v542_v2 = vld [vmem:[%s582_s3] sm:$0x3]  ;;  %s327_s19 = sshll.u32 %s436_s18, 4  ;;  %s328_s19 = int_to_ptr.vmem [resolvable:$true] %s327_s19 }
  0x29   :  { %v67_v18 = vcombine.high %v47_v14, %v47_v14  ;;  %v116_v20 = vcombine.high %v112_v15, %v112_v15  ;;  %vm295_vm3 = vcmp.ge.s32.totalorder %v542_v2, 0  ;;  %s402_s21 = scalar_lea.vmem %s328_s19, 128  ;;  %p407_p3 = scmp.lt.s32.totalorder %s328_s19, %s328_s19 }
  0x2a   :  { %v490_v6 = vsub.s32 %v53_v5, %v487_v4  ;;  %v50_v16 = vcombine.high %v46_v11, %v46_v11  ;;  %v133_v33 = vcombine.high %v113_v19, %v113_v19  ;;  %p403_p2 = scmp.ne.s32.totalorder %s328_s19, %s402_s21  ;;  %p408_p4 = scmp.lt.s32.totalorder %s402_s21, %s402_s21 }
  0x2c   :  { %v57_v17 = vrot.slane %v46_v11, %v490_v6  ;;  %v123_v21 = vrot.slane %v112_v15, %v490_v6  ;;  %v64_v22 = vrot.slane %v50_v16, %v490_v6  ;;  %v74_v24 = vrot.slane %v47_v14, %v490_v6  ;;  %p409_p5 = por %p408_p4, %p407_p3 }
  0x2d   :  { %v130_v26 = vrot.slane %v116_v20, %v490_v6  ;;  %v81_v31 = vrot.slane %v67_v18, %v490_v6  ;;  %v140_v37 = vrot.slane %v113_v19, %v490_v6  ;;  %v147_v45 = vrot.slane %v133_v33, %v490_v6 }
  0x2e   :  { %v65_v23 = vcombine.high %v57_v17, %v57_v17  ;;  %v93_v25 = vsel %vm92_vm1, %v57_v17, 0.0  ;;  %v66_v27 = vcombine.high %v64_v22, %v64_v22  ;;  %v96_v29 = vsel %vm92_vm1, %v64_v22, 0.0  ;;  %p410_p6 = pnand %p409_p5, %p403_p2 }
  0x2f   :  { %v131_v30 = vcombine.high %v123_v21, %v123_v21  ;;  %v82_v34 = vcombine.high %v74_v24, %v74_v24  ;;  %v132_v36 = vcombine.high %v130_v26, %v130_v26  ;;  %v158_v39 = vsel %vm92_vm1, %v123_v21, 0.0 }
  0x30   :  { %v94_v28 = vsel %vm92_vm1, %v65_v23, 0.0  ;;  %v98_v35 = vsel %vm92_vm1, %v66_v27, 0.0  ;;  %v100_v41 = vsel %vm92_vm1, %v74_v24, 0.0  ;;  %v161_v43 = vsel %vm92_vm1, %v130_v26, 0.0 }
  0x31   :  { %v95_v32 = vadd.f32 %v94_v28, %v93_v25  ;;  %v159_v40 = vsel %vm92_vm1, %v131_v30, 0.0  ;;  %v148_v46 = vcombine.high %v140_v37, %v140_v37  ;;  %v163_v47 = vsel %vm92_vm1, %v132_v36, 0.0 }
  0x32   :  { %v160_v42 = vadd.f32 %v159_v40, %v158_v39  ;;  %v83_v48 = vcombine.high %v81_v31, %v81_v31  ;;  %v102_v49 = vsel %vm92_vm1, %v82_v34, 0.0  ;;  %v165_v52 = vsel %vm92_vm1, %v140_v37, 0.0 }
  0x33   :  { %v97_v38 = vadd.f32 %v96_v29, %v95_v32  ;;  %v104_v53 = vsel %vm92_vm1, %v81_v31, 0.0  ;;  %v149_v56 = vcombine.high %v147_v45, %v147_v45  ;;  %v167_v57 = vsel %vm92_vm1, %v148_v46, 0.0 }
  0x34   :  { %v162_v50 = vadd.f32 %v161_v43, %v160_v42  ;;  %v106_v58 = vsel %vm92_vm1, %v83_v48, 0.0  ;;  %v169_v61 = vsel %vm92_vm1, %v147_v45, 0.0  ;;  %v286_v15 = vand.u32 127, %v54_v0 }
  0x35   :  { %v99_v44 = vadd.f32 %v98_v35, %v97_v38  ;;  %v171_v1 = vsel %vm92_vm1, %v149_v56, 0.0  ;;  %v434_v23 = vmov 269488144  }
  0x36   :  { %v164_v54 = vadd.f32 %v163_v47, %v162_v50  ;;  %v179_v24 = vunpack.c.l.s4 %v434_v23 }
  0x37   :  { %v101_v51 = vadd.f32 %v100_v41, %v99_v44 }
  0x38   :  { %v166_v59 = vadd.f32 %v165_v52, %v164_v54  ;;  %v180_v26 = vunpack.c.0.s8 %v179_v24 }
  0x39   :  { %v103_v55 = vadd.f32 %v102_v49, %v101_v51 }
  0x3a   :  { %v168_v62 = vadd.f32 %v167_v57, %v166_v59  ;;  %v183_v0 = vsub.s32 %v180_v26, %v487_v4 }
  0x3b   :  { %v105_v60 = vadd.f32 %v104_v53, %v103_v55 }
  0x3c   :  { %v170_v3 = vadd.f32 %v169_v61, %v168_v62  ;;  %v435_v62 = vmov 0.0  }
  0x3d   :  { %v107_v63 = vadd.f32 %v106_v58, %v105_v60 }
  0x3e   :  { %v172_v5 = vadd.f32 %v171_v1, %v170_v3  ;;  %288 = vperm.xlu0 %349, %v542_v2  }
  0x3f   :  { %108 = vadd.xlane.f32.xlu1 %v107_v63  ;;  %v337_v63 = vsel %vm295_vm3, 1.0, %v435_v62 }
  0x43   :  { %173 = vadd.xlane.f32.xlu1 %v172_v5 }
  0xb5   :  { %v276_v9 = vpop.xlane.xlu0 %275 }
  0xb6   :  { %v277_v11 = vsub.f32 %v495_v7, %v276_v9 }
  0xb8   :  { %v278_v14 = vmul.f32 1.442695, %v277_v11 }
  0xba   :  { %350 = vpow2.f32 %v278_v14 }
  0xbd   :  { %v289_v16 = vpop.permute.xlu0 %288 }
  0xbe   :  { %vm290_vm2 = vcmp.eq.s32.totalorder %v286_v15, %v289_v16 }
  0xbf   :  { %v291_v19 = vsel %vm290_vm2, %v277_v11, 0.0 }
  0xc0   :  { %v292_v20 = vsel %vm273_vm0, %v291_v19, 0.0 }
  0xc4   :  { %v351_v17 = vpop.eup %350 }
  0xc5   :  { %v280_v18 = vsel %vm273_vm0, %v351_v17, 0.0 }
  0xc6   :  { %281 = vadd.xlane.f32.xlu1 %v280_v18 }
  0xca   :  { %293 = vadd.xlane.f32.xlu1 %v292_v20 }
  0xcc   :  { %v109_v21 = vpop.xlane.xlu1 %108 }
  0xcd   :  { %v110_v22 = vmax.f32 %v109_v21, 1e-24 }
  0xcf   :  { %352 = vrsqrt.f32 %v110_v22 }
  0xd0   :  { %v174_v7 = vpop.xlane.xlu1 %173 }
  0xd1   :  { %v175_v25 = vmax.f32 %v174_v7, 1e-24 }
  0xd3   :  { %354 = vrsqrt.f32 %v175_v25 }
  0xd9   :  { %v353_v27 = vpop.eup %352 }
  0xda   :  { %v195_v28 = vrot.slane %v353_v27, %v183_v0 }
  0xdc   :  { %v197_v30 = vmul.f32 %v195_v28, %v497_v8  ;;  %v198_v32 = vmul.f32 %v195_v28, %v501_v10 }
  0xdd   :  { %v355_v29 = vpop.eup %354 }
  0xde   :  { %v184_v31 = vrot.slane %v355_v29, %v183_v0 }
  0xe0   :  { %v186_v33 = vmul.f32 %v184_v31, %v505_v12  ;;  %v187_v34 = vmul.f32 %v184_v31, %v507_v13 }
  0xe2   :  { %v199_v35 = vsub.f32 %v186_v33, %v197_v30  ;;  %v200_v36 = vsub.f32 %v187_v34, %v198_v32 }
  0xe4   :  { %v201_v37 = vand.u32 2147483647, %v199_v35  ;;  %v202_v38 = vand.u32 2147483647, %v200_v36 }
  0xe6   :  { %v205_v39 = vcombine.high %v201_v37, %v201_v37  ;;  %v212_v40 = vrot.slane %v201_v37, %v490_v6  ;;  %v222_v42 = vcombine.high %v202_v38, %v202_v38  ;;  %v229_v8 = vrot.slane %v202_v38, %v490_v6 }
  0xe8   :  { %v219_v4 = vrot.slane %v205_v39, %v490_v6  ;;  %v220_v41 = vcombine.high %v212_v40, %v212_v40  ;;  %v247_v43 = vsel %vm92_vm1, %v212_v40, 0.0  ;;  %v236_v45 = vrot.slane %v222_v42, %v490_v6 }
  0xe9   :  { %v237_v46 = vcombine.high %v229_v8, %v229_v8  ;;  %v254_v49 = vsel %vm92_vm1, %v229_v8, 0.0 }
  0xea   :  { %v221_v10 = vcombine.high %v219_v4, %v219_v4  ;;  %v248_v12 = vsel %vm92_vm1, %v220_v41, 0.0  ;;  %v250_v13 = vsel %vm92_vm1, %v219_v4, 0.0  ;;  %v238_v51 = vcombine.high %v236_v45, %v236_v45 }
  0xeb   :  { %v249_v44 = vadd.f32 %v248_v12, %v247_v43  ;;  %v256_v52 = vsel %vm92_vm1, %v237_v46, 0.0  ;;  %v258_v54 = vsel %vm92_vm1, %v236_v45, 0.0 }
  0xec   :  { %v252_v47 = vsel %vm92_vm1, %v221_v10, 0.0  ;;  %v260_v56 = vsel %vm92_vm1, %v238_v51, 0.0 }
  0xed   :  { %v251_v48 = vadd.f32 %v250_v13, %v249_v44 }
  0xef   :  { %v253_v50 = vadd.f32 %v252_v47, %v251_v48 }
  0xf1   :  { %v255_v53 = vadd.f32 %v254_v49, %v253_v50 }
  0xf3   :  { %v257_v55 = vadd.f32 %v256_v52, %v255_v53 }
  0xf5   :  { %v259_v57 = vadd.f32 %v258_v54, %v257_v55 }
  0xf7   :  { %v261_v58 = vadd.f32 %v260_v56, %v259_v57 }
  0xf9   :  { %262 = vadd.xlane.f32.xlu1 %v261_v58 }
 0x153   :  { %v282_v6 = vpop.xlane.xlu1 %281 }
 0x154   :  { %356 = vlog2.f32 %v282_v6 }
 0x157   :  { %v294_v61 = vpop.xlane.xlu1 %293 }
 0x15e   :  { %v357_v59 = vpop.eup %356 }
 0x15f   :  { %v284_v60 = vmul.f32 0.6931472, %v357_v59 }
 0x161   :  { %v298_v1 = vsub.f32 %v284_v60, %v294_v61 }
 0x163   :  { %v299_v3 = vmul.f32 %v337_v63, %v298_v1 }
 0x165   :  { %v301_v5 = vsel %vm300_vm4, %v299_v3, 0.0 }
 0x166   :  { %302 = vadd.xlane.f32.xlu1 %v301_v5 }
 0x186   :  { %v263_v9 = vpop.xlane.xlu1 %262 }
 0x187   :  { %v264_v11 = vrot.slane %v263_v9, 4 }
 0x189   :  { %v265_v14 = vadd.f32 %v264_v11, %v263_v9 }
 0x18b   :  { %v266_v15 = vrot.slane %v265_v14, 2 }
 0x18d   :  { %v267_v16 = vadd.f32 %v266_v15, %v265_v14 }
 0x18f   :  { %v268_v17 = vrot.slane %v267_v16, 1 }
 0x191   :  { %v269_v18 = vadd.f32 %v268_v17, %v267_v16 }
 0x193   :  { %338 = vpush %v269_v18 }
 0x1c4   :  { %s339_s3 = spop %338 }
 0x1c5   :  { %s314_s14 = smul.f32 0.5, %s339_s3 }
 0x1c7   :  { %s317_s15 = smul.f32 0.00048828125, %s314_s14 }
 0x1f3   :  { %v303_v19 = vpop.xlane.xlu1 %302 }
 0x1f4   :  { %v304_v2 = vrot.slane %v303_v19, 4 }
 0x1f6   :  { %v305_v20 = vadd.f32 %v304_v2, %v303_v19 }
 0x1f8   :  { %v306_v21 = vrot.slane %v305_v20, 2 }
 0x1fa   :  { %v307_v22 = vadd.f32 %v306_v21, %v305_v20 }
 0x1fc   :  { %v308_v23 = vrot.slane %v307_v22, 1 }
 0x1fe   :  { %v309_v24 = vadd.f32 %v308_v23, %v307_v22 }
 0x200   :  { %340 = vpush %v309_v24 }
 0x231   :  { %s341_s16 = spop %340 }
 0x232   :  { %s313_s17 = smul.f32 0.5, %s341_s16 }
 0x234   :  { %s318_s20 = sadd.f32 %s317_s15, %s313_s17 }
 0x236   :  { %v319_v7 = vstv %s318_s20 }
 0x237   :  { %320 = vst [vmem:[#allocation7] sm:$0xff] %v319_v7 }
 0x238   :  { %413 = shalt.err (!%p410_p6)
}
 0x239   :  { %s414_s24 = scalar_lea.hbm %s583_s4, 128 }
 0x23a   :  { %p415_p7 = scmp.ne.s32.totalorder %s583_s4, %s414_s24  ;;  %p418_p8 = scmp.lt.u32.totalorder %s414_s24, %s583_s4 }
 0x23c   :  { %p420_p9 = pnand %p418_p8, %p415_p7 }
 0x23e   :  { %423 = shalt.err (!%p420_p9)
}
 0x23f   :  { %330 = dma.vmem_to_hbm [thread:$0]  %s328_s19, 128, %s583_s4, [#allocation4]  }
 0x240   :  { %428 = dma.done.wait [#allocation4], 128  }
 0x241   :  { %429 = vsyncadd [#allocation4], 4294967168 }
 0x242   :  { %334 = vsyncpa [#allocation3], 1 }
 0x243   :  { %335 = vsyncpa [#allocation6], 1 }
 0x244   :  { %336 = vsyncpa [#allocation4], 1 }

</bundles_post_ra>
